<compile_context>
chip_gen: v7x
topology: tpu7x:2x2x1
jax: 0.10.0
libtpu: 0.0.40
codegen_flags: <defaults>
</compile_context>

<pallas_src>
import jax
import jax.numpy as jnp
from jax.experimental import pallas as pl
from jax.experimental.pallas import tpu as pltpu

LN_EPS = 1e-5  # PyTorch nn.LayerNorm default eps


def _round_up(x, m):
    return (x + m - 1) // m * m


def _ln_finalize(y, out_size, out_p, ln_eps, g, beta, out_dtype):
    """LayerNorm (stats over real out_size lanes) + affine, padded lanes -> 0."""
    inv_n = 1.0 / float(out_size)
    mean = jnp.sum(y, axis=-1, keepdims=True) * inv_n
    centered = y - mean
    if out_p != out_size:
        lane = jax.lax.broadcasted_iota(jnp.int32, y.shape, 1)
        csq = jnp.where(lane < out_size, centered, 0.0)
    else:
        csq = centered
    var = jnp.sum(csq * csq, axis=-1, keepdims=True) * inv_n
    y_norm = centered * jax.lax.rsqrt(var + ln_eps)
    # gamma/beta padded lanes are 0 -> padded output lanes come out exactly 0.
    return (y_norm * g + beta).astype(out_dtype)


def _make_fused_kernel(out_size, out_p, ln_eps):
    """Single K block: matmul result never leaves vregs before the store."""

    def kernel(x_ref, w_ref, b_ref, g_ref, beta_ref, o_ref):
        y = jnp.dot(x_ref[...], w_ref[...], preferred_element_type=jnp.float32)
        # Padded feature lanes: zero weight cols + zero bias -> ReLU(0) = 0.
        y = jnp.maximum(y + b_ref[...], 0.0)
        o_ref[...] = _ln_finalize(y, out_size, out_p, ln_eps,
                                  g_ref[...], beta_ref[...], o_ref.dtype)

    return kernel


def _make_acc_kernel(out_size, out_p, ln_eps):
    """K-tiled reduction with f32 VMEM accumulator; finalize on last K step."""

    def kernel(x_ref, w_ref, b_ref, g_ref, beta_ref, o_ref, acc_ref):
        k = pl.program_id(1)

        @pl.when(k == 0)
        def _init():
            acc_ref[...] = jnp.zeros_like(acc_ref)

        acc_ref[...] += jnp.dot(x_ref[...], w_ref[...],
                                preferred_element_type=jnp.float32)

        @pl.when(k == pl.num_programs(1) - 1)
        def _finalize():
            y = jnp.maximum(acc_ref[...] + b_ref[...], 0.0)
            o_ref[...] = _ln_finalize(y, out_size, out_p, ln_eps,
                                      g_ref[...], beta_ref[...], o_ref.dtype)

    return kernel


def linear_cell(x, w_t, b, gamma, beta, *, tile_m=256, tile_k=None,
                out_dtype=None, ln_eps=LN_EPS):
    """LinearCell forward (eval mode).

    x      : (B, input_size)            any float dtype (bf16 recommended for MXU).
    w_t    : (input_size, output_size)  PyTorch nn.Linear weight, transposed.
    b, gamma, beta : (output_size,)     Linear bias, LN weight, LN bias.
    Returns (B, output_size) in `out_dtype` (default: x.dtype).
    """
    B, in_size = x.shape
    assert w_t.shape[0] == in_size
    out_size = w_t.shape[1]
    out_dtype = jnp.dtype(out_dtype if out_dtype is not None else x.dtype)

    # --- feature (lane) padding: keep output lane-dense (multiple of 128). ---
    out_p = _round_up(out_size, 128)
    pad_o = out_p - out_size

    # --- K (input-feature) tiling. Single block for moderate sizes. ---
    if tile_k is None:
        tile_k = in_size if in_size <= 2048 else 512
    tile_k = min(tile_k, in_size)
    if tile_k < in_size:
        tile_k = _round_up(tile_k, 128)
        in_p = _round_up(in_size, tile_k)
    else:
        in_p = in_size
    num_k = in_p // tile_k

    # --- batch (M) tiling: multiple of 8 so the pipeline overlaps DMA with
    #     compute and megacore gets sharded work. ---
    if tile_m >= B:
        tile_m = B
    else:
        tile_m = max(8, (tile_m // 8) * 8)
    num_m = pl.cdiv(B, tile_m)

    # --- zero-pad operands (zeros are neutral for matmul + masked LN). ---
    xp = jnp.pad(x, ((0, 0), (0, in_p - in_size))) if in_p != in_size else x
    wp = w_t
    if in_p != in_size or out_p != out_size:
        wp = jnp.pad(w_t, ((0, in_p - in_size), (0, pad_o)))
    b2 = jnp.pad(b.astype(jnp.float32), (0, pad_o)).reshape(1, out_p)
    g2 = jnp.pad(gamma.astype(jnp.float32), (0, pad_o)).reshape(1, out_p)
    beta2 = jnp.pad(beta.astype(jnp.float32), (0, pad_o)).reshape(1, out_p)

    x_isz = jnp.dtype(x.dtype).itemsize
    w_isz = jnp.dtype(w_t.dtype).itemsize
    o_isz = out_dtype.itemsize

    cost = pl.CostEstimate(
        flops=2 * B * in_p * out_p,
        transcendentals=B,  # one rsqrt per row
        bytes_accessed=(B * in_p * x_isz + in_p * out_p * w_isz
                        + 3 * out_p * 4 + B * out_p * o_isz),
    )

    # VMEM budget estimate (double-buffered x/out, weight buffer(s), f32 acc).
    w_bufs = 1 if num_k == 1 else 2
    acc_bytes = 0 if num_k == 1 else tile_m * out_p * 4
    vmem_est = (2 * tile_m * tile_k * x_isz
                + w_bufs * tile_k * out_p * w_isz
                + 2 * tile_m * out_p * o_isz
                + acc_bytes
                + 6 * out_p * 4)
    vmem_limit = int(min(100 * 2 ** 20, max(32 * 2 ** 20, 2 * vmem_est)))

    def build(single_buffer_params):
        if single_buffer_params:
            def const_spec(shape, index_map):
                # Constant-index blocks: double-buffering is pure VMEM waste.
                return pl.BlockSpec(shape, index_map,
                                    pipeline_mode=pl.Buffered(buffer_count=1))
        else:
            const_spec = pl.BlockSpec

        if num_k == 1:
            kernel = _make_fused_kernel(out_size, out_p, ln_eps)
            grid = (num_m,)
            in_specs = [
                pl.BlockSpec((tile_m, tile_k), lambda i: (i, 0)),
                const_spec((tile_k, out_p), lambda i: (0, 0)),
                const_spec((1, out_p), lambda i: (0, 0)),
                const_spec((1, out_p), lambda i: (0, 0)),
                const_spec((1, out_p), lambda i: (0, 0)),
            ]
            out_specs = pl.BlockSpec((tile_m, out_p), lambda i: (i, 0))
            scratch_shapes = []
            dims = ("parallel",)
        else:
            kernel = _make_acc_kernel(out_size, out_p, ln_eps)
            grid = (num_m, num_k)
            in_specs = [
                pl.BlockSpec((tile_m, tile_k), lambda i, k: (i, k)),
                pl.BlockSpec((tile_k, out_p), lambda i, k: (k, 0)),
                const_spec((1, out_p), lambda i, k: (0, 0)),
                const_spec((1, out_p), lambda i, k: (0, 0)),
                const_spec((1, out_p), lambda i, k: (0, 0)),
            ]
            out_specs = pl.BlockSpec((tile_m, out_p), lambda i, k: (i, 0))
            scratch_shapes = [pltpu.VMEM((tile_m, out_p), jnp.float32)]
            dims = ("parallel", "arbitrary")

        grid_spec = pltpu.PrefetchScalarGridSpec(
            num_scalar_prefetch=0,
            grid=grid,
            in_specs=in_specs,
            out_specs=out_specs,
            scratch_shapes=scratch_shapes,
        )
        return pl.pallas_call(
            kernel,
            out_shape=jax.ShapeDtypeStruct((B, out_p), out_dtype),
            grid_spec=grid_spec,
            compiler_params=pltpu.CompilerParams(
                dimension_semantics=dims,
                vmem_limit_bytes=vmem_limit,
            ),
            cost_estimate=cost,
        )

    try:
        out = build(True)(xp, wp, b2, g2, beta2)
    except Exception:
        # JAX build without BlockSpec.pipeline_mode / pl.Buffered(1) support:
        # fall back to default double-buffering (identical semantics).
        out = build(False)(xp, wp, b2, g2, beta2)

    return out[:, :out_size] if out_p != out_size else out


def _reference(x, w, b, gamma, beta):
    """Pure-JAX reference (eval-mode dropout == identity)."""
    y_lin = jnp.maximum(x @ w.T + b, 0.0)
    mu = jnp.mean(y_lin, axis=-1, keepdims=True)
    var = jnp.mean((y_lin - mu) ** 2, axis=-1, keepdims=True)
    return (y_lin - mu) * jax.lax.rsqrt(var + LN_EPS) * gamma + beta


if __name__ == "__main__":
    key = jax.random.PRNGKey(0)

    # ---------- case 1: small, fused (num_k == 1), lane-padded output -------
    k_x, k_w, k_b = jax.random.split(key, 3)
    batch, input_size, output_size = 40, 32, 64   # out < 128 -> padding path

    x = jax.random.normal(k_x, (batch, input_size), dtype=jnp.float32)
    bound = 1.0 / (input_size ** 0.5)
    w = jax.random.uniform(k_w, (output_size, input_size),
                           minval=-bound, maxval=bound, dtype=jnp.float32)
    b = jax.random.uniform(k_b, (output_size,),
                           minval=-bound, maxval=bound, dtype=jnp.float32)
    gamma = jnp.ones((output_size,), dtype=jnp.float32)
    beta = jnp.zeros((output_size,), dtype=jnp.float32)

    y_ref = _reference(x, w, b, gamma, beta)

    out = jax.block_until_ready(linear_cell(x, w.T, b, gamma, beta, tile_m=16))
    assert out.shape == (batch, output_size)
    assert jnp.allclose(out, y_ref, atol=1e-5, rtol=1e-5), "f32 mismatch (fused)"

    # bf16 operands: native bf16 into the MXU, f32 accumulate, bf16 out.
    out_bf16 = jax.block_until_ready(
        linear_cell(x.astype(jnp.bfloat16), w.T.astype(jnp.bfloat16),
                    b, gamma, beta, tile_m=16))
    assert out_bf16.dtype == jnp.bfloat16
    assert jnp.allclose(out_bf16.astype(jnp.float32), y_ref, atol=1e-1, rtol=1e-1), \
        "bf16 mismatch (fused)"

    # ---------- case 2: K-tiled accumulator path (num_k > 1) ----------------
    k_x2, k_w2, k_b2, k_g2, k_be2 = jax.random.split(jax.random.PRNGKey(0), 5)
    batch2, in2, out2 = 24, 256, 192              # out padded 192 -> 256

    x2 = jax.random.normal(k_x2, (batch2, in2), dtype=jnp.float32)
    bound2 = 1.0 / (in2 ** 0.5)
    w2 = jax.random.uniform(k_w2, (out2, in2),
                            minval=-bound2, maxval=bound2, dtype=jnp.float32)
    b_2 = jax.random.uniform(k_b2, (out2,),
                             minval=-bound2, maxval=bound2, dtype=jnp.float32)
    g_2 = 1.0 + 0.1 * jax.random.normal(k_g2, (out2,), dtype=jnp.float32)
    be_2 = 0.1 * jax.random.normal(k_be2, (out2,), dtype=jnp.float32)

    y_ref2 = _reference(x2, w2, b_2, g_2, be_2)
    out2_k = jax.block_until_ready(
        linear_cell(x2, w2.T, b_2, g_2, be_2, tile_m=16, tile_k=128))
    assert out2_k.shape == (batch2, out2)
    assert jnp.allclose(out2_k, y_ref2, atol=1e-4, rtol=1e-4), "f32 mismatch (K-tiled)"

    print("KERNEL_OK")
</pallas_src>

<mosaic_0001>
module attributes {stable_mosaic.version = 11 : i64} {
  func.func @kernel(%arg0: i32, %arg1: memref<16x32xf32, #tpu.memory_space<vmem>>, %arg2: memref<32x128xf32, #tpu.memory_space<vmem>>, %arg3: memref<1x128xf32, #tpu.memory_space<vmem>>, %arg4: memref<1x128xf32, #tpu.memory_space<vmem>>, %arg5: memref<1x128xf32, #tpu.memory_space<vmem>>, %arg6: memref<16x128xf32, #tpu.memory_space<vmem>>) attributes {dimension_semantics = [#tpu.dimension_semantics<parallel>], iteration_bounds = array<i64: 3>, scalar_prefetch = 0 : i64, scratch_operands = 0 : i64, tpu.core_type = #tpu.core_type<tc>, window_params = [{transform_indices = @transform_0, window_bounds = array<i64: 16, 32>}, {pipeline_mode = #tpu.pipeline_mode<synchronous>, transform_indices = @transform_1, window_bounds = array<i64: 32, 128>}, {pipeline_mode = #tpu.pipeline_mode<synchronous>, transform_indices = @transform_2, window_bounds = array<i64: 1, 128>}, {pipeline_mode = #tpu.pipeline_mode<synchronous>, transform_indices = @transform_3, window_bounds = array<i64: 1, 128>}, {pipeline_mode = #tpu.pipeline_mode<synchronous>, transform_indices = @transform_4, window_bounds = array<i64: 1, 128>}, {transform_indices = @transform_5, window_bounds = array<i64: 16, 128>}]} {
    %c0 = arith.constant 0 : index
    %c0_0 = arith.constant 0 : index
    %0 = vector.load %arg1[%c0, %c0_0] : memref<16x32xf32, #tpu.memory_space<vmem>>, vector<16x32xf32>
    %c0_1 = arith.constant 0 : index
    %c0_2 = arith.constant 0 : index
    %1 = vector.load %arg2[%c0_1, %c0_2] : memref<32x128xf32, #tpu.memory_space<vmem>>, vector<32x128xf32>
    %cst = arith.constant dense<0.000000e+00> : vector<16x128xf32>
    %2 = tpu.matmul %0, %1, %cst {dimension_numbers = #tpu.dot_dimension_numbers<[1], [0], [0], [1], [0, 0, 1, 1], [], []>} : vector<16x32xf32>, vector<32x128xf32>, vector<16x128xf32> -> vector<16x128xf32>
    %c0_3 = arith.constant 0 : index
    %c0_4 = arith.constant 0 : index
    %3 = vector.load %arg3[%c0_3, %c0_4] : memref<1x128xf32, #tpu.memory_space<vmem>>, vector<1x128xf32>
    %4 = vector.broadcast %3 : vector<1x128xf32> to vector<16x128xf32>
    %5 = arith.addf %2, %4 : vector<16x128xf32>
    %cst_5 = arith.constant 0.000000e+00 : f32
    %6 = vector.broadcast %cst_5 : f32 to vector<16x128xf32>
    %7 = arith.maximumf %5, %6 : vector<16x128xf32>
    %c0_6 = arith.constant 0 : index
    %c0_7 = arith.constant 0 : index
    %8 = vector.load %arg4[%c0_6, %c0_7] : memref<1x128xf32, #tpu.memory_space<vmem>>, vector<1x128xf32>
    %c0_8 = arith.constant 0 : index
    %c0_9 = arith.constant 0 : index
    %9 = vector.load %arg5[%c0_8, %c0_9] : memref<1x128xf32, #tpu.memory_space<vmem>>, vector<1x128xf32>
    %cst_10 = arith.constant dense<0.000000e+00> : vector<16xf32>
    %10 = vector.multi_reduction <add>, %7, %cst_10 [1] : vector<16x128xf32> to vector<16xf32>
    %11 = vector.shape_cast %10 : vector<16xf32> to vector<16x1xf32>
    %cst_11 = arith.constant 1.562500e-02 : f32
    %12 = vector.broadcast %cst_11 : f32 to vector<16x1xf32>
    %13 = arith.mulf %11, %12 : vector<16x1xf32>
    %14 = vector.broadcast %13 : vector<16x1xf32> to vector<16x128xf32>
    %15 = arith.subf %7, %14 : vector<16x128xf32>
    %16 = tpu.iota {dimensions = array<i32: 1>} : vector<16x128xi32>
    %c64_i32 = arith.constant 64 : i32
    %17 = vector.broadcast %c64_i32 : i32 to vector<16x128xi32>
    %18 = arith.cmpi slt, %16, %17 : vector<16x128xi32>
    %cst_12 = arith.constant 0.000000e+00 : f32
    %19 = vector.broadcast %cst_12 : f32 to vector<16x128xf32>
    %20 = arith.select %18, %15, %19 : vector<16x128xi1>, vector<16x128xf32>
    %21 = arith.mulf %20, %20 : vector<16x128xf32>
    %cst_13 = arith.constant dense<0.000000e+00> : vector<16xf32>
    %22 = vector.multi_reduction <add>, %21, %cst_13 [1] : vector<16x128xf32> to vector<16xf32>
    %23 = vector.shape_cast %22 : vector<16xf32> to vector<16x1xf32>
    %cst_14 = arith.constant 1.562500e-02 : f32
    %24 = vector.broadcast %cst_14 : f32 to vector<16x1xf32>
    %25 = arith.mulf %23, %24 : vector<16x1xf32>
    %cst_15 = arith.constant 9.99999974E-6 : f32
    %26 = vector.broadcast %cst_15 : f32 to vector<16x1xf32>
    %27 = arith.addf %25, %26 : vector<16x1xf32>
    %28 = math.rsqrt %27 : vector<16x1xf32>
    %29 = vector.broadcast %28 : vector<16x1xf32> to vector<16x128xf32>
    %30 = arith.mulf %15, %29 : vector<16x128xf32>
    %31 = vector.broadcast %8 : vector<1x128xf32> to vector<16x128xf32>
    %32 = arith.mulf %30, %31 : vector<16x128xf32>
    %33 = vector.broadcast %9 : vector<1x128xf32> to vector<16x128xf32>
    %34 = arith.addf %32, %33 : vector<16x128xf32>
    %c0_16 = arith.constant 0 : index
    %c0_17 = arith.constant 0 : index
    %35 = vector.load %arg6[%c0_16, %c0_17] : memref<16x128xf32, #tpu.memory_space<vmem>>, vector<16x128xf32>
    tpu.vector_store %arg6[%c0_16, %c0_17], %34 {strides = array<i32>} : memref<16x128xf32, #tpu.memory_space<vmem>>, vector<16x128xf32>,
    return
  }
  func.func @transform_0(%arg0: i32) -> (i32, i32) {
    %c0_i32 = arith.constant 0 : i32
    %c0_i32_0 = arith.constant 0 : i32
    return %arg0, %c0_i32 : i32, i32
  }
  func.func @transform_1(%arg0: i32) -> (i32, i32) {
    %c0_i32 = arith.constant 0 : i32
    %c0_i32_0 = arith.constant 0 : i32
    %c0_i32_1 = arith.constant 0 : i32
    return %c0_i32, %c0_i32_0 : i32, i32
  }
  func.func @transform_2(%arg0: i32) -> (i32, i32) {
    %c0_i32 = arith.constant 0 : i32
    %c0_i32_0 = arith.constant 0 : i32
    %c0_i32_1 = arith.constant 0 : i32
    return %c0_i32, %c0_i32_0 : i32, i32
  }
  func.func @transform_3(%arg0: i32) -> (i32, i32) {
    %c0_i32 = arith.constant 0 : i32
    %c0_i32_0 = arith.constant 0 : i32
    %c0_i32_1 = arith.constant 0 : i32
    return %c0_i32, %c0_i32_0 : i32, i32
  }
  func.func @transform_4(%arg0: i32) -> (i32, i32) {
    %c0_i32 = arith.constant 0 : i32
    %c0_i32_0 = arith.constant 0 : i32
    %c0_i32_1 = arith.constant 0 : i32
    return %c0_i32, %c0_i32_0 : i32, i32
  }
  func.func @transform_5(%arg0: i32) -> (i32, i32) {
    %c0_i32 = arith.constant 0 : i32
    %c0_i32_0 = arith.constant 0 : i32
    return %arg0, %c0_i32 : i32, i32
  }
}

module attributes {stable_mosaic.version = 11 : i64} {
  func.func @kernel(%arg0: i32, %arg1: memref<16x32xf32, #tpu.memory_space<vmem>>, %arg2: memref<32x128xf32, #tpu.memory_space<vmem>>, %arg3: memref<1x128xf32, #tpu.memory_space<vmem>>, %arg4: memref<1x128xf32, #tpu.memory_space<vmem>>, %arg5: memref<1x128xf32, #tpu.memory_space<vmem>>, %arg6: memref<16x128xf32, #tpu.memory_space<vmem>>) attributes {dimension_semantics = [#tpu.dimension_semantics<parallel>], iteration_bounds = array<i64: 3>, scalar_prefetch = 0 : i64, scratch_operands = 0 : i64, tpu.core_type = #tpu.core_type<tc>, window_params = [{transform_indices = @transform_0, window_bounds = array<i64: 16, 32>}, {pipeline_mode = #tpu.pipeline_mode<synchronous>, transform_indices = @transform_1, window_bounds = array<i64: 32, 128>}, {pipeline_mode = #tpu.pipeline_mode<synchronous>, transform_indices = @transform_2, window_bounds = array<i64: 1, 128>}, {pipeline_mode = #tpu.pipeline_mode<synchronous>, transform_indices = @transform_3, window_bounds = array<i64: 1, 128>}, {pipeline_mode = #tpu.pipeline_mode<synchronous>, transform_indices = @transform_4, window_bounds = array<i64: 1, 128>}, {transform_indices = @transform_5, window_bounds = array<i64: 16, 128>}]} {
    %c0 = arith.constant 0 : index
    %c0_0 = arith.constant 0 : index
    %0 = vector.load %arg1[%c0, %c0_0] : memref<16x32xf32, #tpu.memory_space<vmem>>, vector<16x32xf32>
    %c0_1 = arith.constant 0 : index
    %c0_2 = arith.constant 0 : index
    %1 = vector.load %arg2[%c0_1, %c0_2] : memref<32x128xf32, #tpu.memory_space<vmem>>, vector<32x128xf32>
    %cst = arith.constant dense<0.000000e+00> : vector<16x128xf32>
    %2 = tpu.matmul %0, %1, %cst {dimension_numbers = #tpu.dot_dimension_numbers<[1], [0], [0], [1], [0, 0, 1, 1], [], []>} : vector<16x32xf32>, vector<32x128xf32>, vector<16x128xf32> -> vector<16x128xf32>
    %c0_3 = arith.constant 0 : index
    %c0_4 = arith.constant 0 : index
    %3 = vector.load %arg3[%c0_3, %c0_4] : memref<1x128xf32, #tpu.memory_space<vmem>>, vector<1x128xf32>
    %4 = vector.broadcast %3 : vector<1x128xf32> to vector<16x128xf32>
    %5 = arith.addf %2, %4 : vector<16x128xf32>
    %cst_5 = arith.constant 0.000000e+00 : f32
    %6 = vector.broadcast %cst_5 : f32 to vector<16x128xf32>
    %7 = arith.maximumf %5, %6 : vector<16x128xf32>
    %c0_6 = arith.constant 0 : index
    %c0_7 = arith.constant 0 : index
    %8 = vector.load %arg4[%c0_6, %c0_7] : memref<1x128xf32, #tpu.memory_space<vmem>>, vector<1x128xf32>
    %c0_8 = arith.constant 0 : index
    %c0_9 = arith.constant 0 : index
    %9 = vector.load %arg5[%c0_8, %c0_9] : memref<1x128xf32, #tpu.memory_space<vmem>>, vector<1x128xf32>
    %cst_10 = arith.constant dense<0.000000e+00> : vector<16xf32>
    %10 = vector.multi_reduction <add>, %7, %cst_10 [1] : vector<16x128xf32> to vector<16xf32>
    %11 = vector.shape_cast %10 : vector<16xf32> to vector<16x1xf32>
    %cst_11 = arith.constant 1.562500e-02 : f32
    %12 = vector.broadcast %cst_11 : f32 to vector<16x1xf32>
    %13 = arith.mulf %11, %12 : vector<16x1xf32>
    %14 = vector.broadcast %13 : vector<16x1xf32> to vector<16x128xf32>
    %15 = arith.subf %7, %14 : vector<16x128xf32>
    %16 = tpu.iota {dimensions = array<i32: 1>} : vector<16x128xi32>
    %c64_i32 = arith.constant 64 : i32
    %17 = vector.broadcast %c64_i32 : i32 to vector<16x128xi32>
    %18 = arith.cmpi slt, %16, %17 : vector<16x128xi32>
    %cst_12 = arith.constant 0.000000e+00 : f32
    %19 = vector.broadcast %cst_12 : f32 to vector<16x128xf32>
    %20 = arith.select %18, %15, %19 : vector<16x128xi1>, vector<16x128xf32>
    %21 = arith.mulf %20, %20 : vector<16x128xf32>
    %cst_13 = arith.constant dense<0.000000e+00> : vector<16xf32>
    %22 = vector.multi_reduction <add>, %21, %cst_13 [1] : vector<16x128xf32> to vector<16xf32>
    %23 = vector.shape_cast %22 : vector<16xf32> to vector<16x1xf32>
    %cst_14 = arith.constant 1.562500e-02 : f32
    %24 = vector.broadcast %cst_14 : f32 to vector<16x1xf32>
    %25 = arith.mulf %23, %24 : vector<16x1xf32>
    %cst_15 = arith.constant 9.99999974E-6 : f32
    %26 = vector.broadcast %cst_15 : f32 to vector<16x1xf32>
    %27 = arith.addf %25, %26 : vector<16x1xf32>
    %28 = math.rsqrt %27 : vector<16x1xf32>
    %29 = vector.broadcast %28 : vector<16x1xf32> to vector<16x128xf32>
    %30 = arith.mulf %15, %29 : vector<16x128xf32>
    %31 = vector.broadcast %8 : vector<1x128xf32> to vector<16x128xf32>
    %32 = arith.mulf %30, %31 : vector<16x128xf32>
    %33 = vector.broadcast %9 : vector<1x128xf32> to vector<16x128xf32>
    %34 = arith.addf %32, %33 : vector<16x128xf32>
    %c0_16 = arith.constant 0 : index
    %c0_17 = arith.constant 0 : index
    %35 = vector.load %arg6[%c0_16, %c0_17] : memref<16x128xf32, #tpu.memory_space<vmem>>, vector<16x128xf32>
    tpu.vector_store %arg6[%c0_16, %c0_17], %34 {strides = array<i32>} : memref<16x128xf32, #tpu.memory_space<vmem>>, vector<16x128xf32>,
    return
  }
  func.func @transform_0(%arg0: i32) -> (i32, i32) {
    %c0_i32 = arith.constant 0 : i32
    %c0_i32_0 = arith.constant 0 : i32
    return %arg0, %c0_i32 : i32, i32
  }
  func.func @transform_1(%arg0: i32) -> (i32, i32) {
    %c0_i32 = arith.constant 0 : i32
    %c0_i32_0 = arith.constant 0 : i32
    %c0_i32_1 = arith.constant 0 : i32
    return %c0_i32, %c0_i32_0 : i32, i32
  }
  func.func @transform_2(%arg0: i32) -> (i32, i32) {
    %c0_i32 = arith.constant 0 : i32
    %c0_i32_0 = arith.constant 0 : i32
    %c0_i32_1 = arith.constant 0 : i32
    return %c0_i32, %c0_i32_0 : i32, i32
  }
  func.func @transform_3(%arg0: i32) -> (i32, i32) {
    %c0_i32 = arith.constant 0 : i32
    %c0_i32_0 = arith.constant 0 : i32
    %c0_i32_1 = arith.constant 0 : i32
    return %c0_i32, %c0_i32_0 : i32, i32
  }
  func.func @transform_4(%arg0: i32) -> (i32, i32) {
    %c0_i32 = arith.constant 0 : i32
    %c0_i32_0 = arith.constant 0 : i32
    %c0_i32_1 = arith.constant 0 : i32
    return %c0_i32, %c0_i32_0 : i32, i32
  }
  func.func @transform_5(%arg0: i32) -> (i32, i32) {
    %c0_i32 = arith.constant 0 : i32
    %c0_i32_0 = arith.constant 0 : i32
    return %arg0, %c0_i32 : i32, i32
  }
}

</mosaic_0001>

<bundles_post_ra>
// kernel: tpu_custom_call.1
= control target key start
LH: loop header
LB: loop body
LE: loop exit
PB: predicated region body
PF: predicated region fallthrough
CT: control target
= control target key end

     0   :  { %10 = vsyncpa [#allocation3], 0  ;;  %s802_s0 = inlined_call_operand.vmem [shape: f32[40,32], index: 0, kind: input, shape index: {}]   ;;  %s803_s1 = inlined_call_operand.vmem [shape: f32[32,128], index: 1, kind: input, shape index: {}]   ;;  %s804_s2 = inlined_call_operand.vmem [shape: f32[1,128], index: 2, kind: input, shape index: {}]   ;;  %s805_s3 = inlined_call_operand.vmem [shape: f32[1,128], index: 3, kind: input, shape index: {}]   ;;  %s806_s4 = inlined_call_operand.vmem [shape: f32[1,128], index: 4, kind: input, shape index: {}]   ;;  %s807_s5 = inlined_call_operand.hbm [shape: f32[40,128], index: 5, kind: output, shape index: {}]  }
   0x1   :  { %12 = vsyncpa [#allocation3 + $0x1], 0  ;;  %s664_s18 = smov 0   ;;  %s666_s19 = smov 0  }
   0x2   :  { %s668_s20 = smov 0   ;;  %s670_s21 = smov 0  }
   0x3 LB: > { %s685_s22 = sadd.s32 4294967295, %s629_s21   ;;  %s476_s23 = sadd.s32 4294967294, %s629_s21   ;;  %s629_s21 = sphi %s670_s21, %s813_s21   ;;  %s625_s20 = sphi %s668_s20, %s812_s20   ;;  %s621_s19 = sphi %s666_s19, %s811_s19   ;;  %s617_s18 = sphi %s664_s18, %s810_s18  }
   0x4   : > { %s689_s24 = sadd.s32 1, %s629_s21   ;;  %s135_s25 = sadd.s32 1, %s625_s20 }
   0x5   : > { %s132_s26 = ssub.s32 %s629_s21, %s689_s24  ;;  %p145_p0 = scmp.ne.s32.totalorder %s625_s20, %s621_s19 }
   0x6   : > { %p133_p1 = scmp.eq.s32.totalorder %s132_s26, 0  ;;  %p146_p2 = scmp.eq.s32.totalorder %s685_s22, 2 }
   0x7   : > { %p151_p3 = scmp.ne.s32.totalorder %s621_s19, %s617_s18  ;;  %p152_p4 = scmp.eq.s32.totalorder %s476_s23, 2 }
   0x8   : > { %s700_s27 = scalar_select %p133_p1, %s625_s20, %s135_s25  }
   0x9   : > { %p702_p5 = por %p146_p2, %p145_p0  ;;  %p706_p6 = por %p152_p4, %p151_p3 }
   0xa   : > { %p479_p7 = scmp.ge.s32.totalorder %s629_s21, 1  ;;  %p199_p8 = scmp.lt.s32.totalorder %s629_s21, 4 }
   0xc   : > { %p200_p9 = pnand %p479_p7, %p199_p8 }
   0xd   : > { %v252_v0 = vld [vmem:[%s803_s1] sm:$0xff] (!%p200_p9)  ;;  %v253_v1 = vld [vmem:[%s803_s1 + $0x8] sm:$0xff] (!%p200_p9)  ;;  %v254_v2 = vld [vmem:[%s803_s1 + $0x10] sm:$0xff] (!%p200_p9)  ;;  %s722_s11 = sshll.u32 (!%p200_p9), %s685_s22, 1  ;;  %vm263_vm0 = vcmask (!%p200_p9), 261120   ;;  %v357_v15 = vlaneseq (!%p200_p9)  ;;  %s228_s30 = sand.u32 (!%p200_p9), 1, %s621_s19  }
   0xe   : > { %203 = sbr.rel (%p200_p9) target bundleno = 589 (0x24d), region = 40  ;;  %v515_v3 = vpack.c.bf16 (!%p200_p9), %v253_v1, %v252_v0  ;;  %v255_v4 = vld [vmem:[%s803_s1 + $0x18] sm:$0xff] (!%p200_p9)  ;;  %p236_p10 = scmp.lt.s32.totalorder (!%p200_p9), %s722_s11, 4  ;;  %v483_v8 = vld [vmem:[%s804_s2] ss:$0 sm:$0xff] (!%p200_p9) }
   0xf   : > { %v519_v5 = vpack.c.bf16 (!%p200_p9), %v255_v4, %v254_v2  ;;  %v358_v16 = vand.u32 (!%p200_p9), 127, %v357_v15  ;;  %v486_v34 = vld [vmem:[%s805_s3] ss:$0 sm:$0xff] (!%p200_p9)  ;;  %s480_s8 = sshll.u32 (!%p200_p9), %s228_s30, 4  ;;  %s742_s13 = scalar_lea.sflag (!%p200_p9), [#allocation3], %s228_s30 }
  0x10   : > { %516 = vmatprep.subr.bf16.mxu0 (!%p200_p9), %v515_v3  ;;  %v487_v36 = vld [vmem:[%s806_s4] ss:$0 sm:$0xff] (!%p200_p9)  ;;  %s230_s12 = scalar_lea.vmem (!%p200_p9), [#allocation2], %s480_s8 }
  0x11   : > { %518 = vmatpush3.bf16.msra.mxu0 (!%p200_p9), %v515_v3  ;;  %vm359_vm1 = vcmp.lt.s32.totalorder (!%p200_p9), %v358_v16, 64 }
  0x12   : > { %520 = vmatprep.subr.bf16.mxu0 (!%p200_p9), %v519_v5 }
  0x15   : > { %s237_s14 = scalar_select %p236_p10, %s722_s11, 4  ;;  %522 = vmatpush3.bf16.msra.mxu0 %v519_v5 }
  0x17   : > { %s482_s15 = sshll.u32 %s237_s14, 3  ;;  %s403_s14 = ssub.s32 (%p702_p5), 5, %s722_s11 }
  0x18   : > { %s239_s23 = scalar_lea.vmem %s802_s0, %s482_s15  ;;  %p404_p11 = scmp.lt.s32.totalorder (%p702_p5), %s403_s14, 2 }
  0x19   : > { %v250_v6 = vld [vmem:[%s239_s23] sm:$0xff]  ;;  %v251_v7 = vld [vmem:[%s239_s23 + $0x8] sm:$0xff] }
  0x1a   : > { %512 = vmatprep.mubr.msk.f32.mxu0 %vm263_vm0, %v250_v6 }
  0x1b   : > { %513 = vmatmul.mubr.msk.f32.vlgmr.msra.gmra.mrb[0].mxu0 %vm263_vm0, %v251_v7 }
  0xee   : > { %v514_v9 = vpop.f32.mrb[0].mxu0 }
  0xef   : > { %v336_v10 = vpop.f32.mrb[1].mxu0  ;;  %v342_v12 = vadd.f32 %v514_v9, %v483_v8 }
  0xf0   : > { %v337_v11 = vadd.f32 %v483_v8, %v336_v10 }
  0xf1   : > { %v346_v14 = vmax.f32 %v342_v12, 0.0 }
  0xf2   : > { %v345_v13 = vmax.f32 %v337_v11, 0.0 }
  0xf4   : > { %349 = vadd.xlane.f32.xlu0 %v345_v13 }
  0xf8   : > { %351 = vadd.xlane.f32.xlu0 %v346_v14 }
 0x181   : > { %v350_v17 = vpop.xlane.xlu0 %349 }
 0x182   : > { %v353_v18 = vmul.f32 0.015625, %v350_v17 }
 0x184   : > { %v355_v19 = vsub.f32 %v345_v13, %v353_v18 }
 0x185   : > { %v352_v20 = vpop.xlane.xlu0 %351 }
 0x186   : > { %v354_v21 = vmul.f32 0.015625, %v352_v20  ;;  %v360_v22 = vsel %vm359_vm1, %v355_v19, 0.0 }
 0x187   : > { %v362_v23 = vmul.f32 %v360_v22, %v360_v22 }
 0x188   : > { %v356_v24 = vsub.f32 %v346_v14, %v354_v21 }
 0x189   : > { %364 = vadd.xlane.f32.xlu1 %v362_v23 }
 0x18a   : > { %v361_v25 = vsel %vm359_vm1, %v356_v24, 0.0 }
 0x18b   : > { %v363_v26 = vmul.f32 %v361_v25, %v361_v25 }
 0x18d   : > { %366 = vadd.xlane.f32.xlu1 %v363_v26 }
 0x216   : > { %v365_v27 = vpop.xlane.xlu1 %364 }
 0x217   : > { %v368_v28 = vmul.f32 0.015625, %v365_v27 }
 0x219   : > { %v370_v29 = vadd.f32 1e-05, %v368_v28 }
 0x21a   : > { %v367_v30 = vpop.xlane.xlu1 %366 }
 0x21b   : > { %563 = vrsqrt.f32 %v370_v29  ;;  %v369_v31 = vmul.f32 0.015625, %v367_v30 }
 0x21d   : > { %v371_v32 = vadd.f32 1e-05, %v369_v31 }
 0x21f   : > { %565 = vrsqrt.f32 %v371_v32 }
 0x225   : > { %v564_v33 = vpop.eup %563 }
 0x226   : > { %v374_v35 = vmul.f32 %v564_v33, %v355_v19 }
 0x228   : > { %v382_v37 = vmul.f32 %v486_v34, %v374_v35 }
 0x229   : > { %v566_v38 = vpop.eup %565 }
 0x22a   : > { %v390_v39 = vadd.f32 %v487_v36, %v382_v37  ;;  %v375_v40 = vmul.f32 %v566_v38, %v356_v24  ;;  %401 = sbr.rel (!%p702_p5) target bundleno = 589 (0x24d), region = 44 }
 0x22c   : > { %392 = vst [vmem:[%s230_s12] sm:$0xff] %v390_v39  ;;  %v383_v41 = vmul.f32 %v486_v34, %v375_v40 }
 0x22e   : > { %v391_v42 = vadd.f32 %v487_v36, %v383_v41 }
 0x230   : > { %393 = vst [vmem:[%s230_s12 + $0x8] sm:$0xff] %v391_v42 }
 0x231   : > { %s815_s14 = smov (!%p404_p11, %s403_s14), 2 }
 0x232   : > { %s747_s15 = sshll.u32 %s815_s14, 7 }
 0x233   : > { %s408_s16 = ssub.s32 256, %s747_s15 }
 0x234   : > { %409 = vsyncadd %s742_s13, %s408_s16  ;;  %p491_p12 = scmp.ne.s32.totalorder %s747_s15, 0  ;;  %s497_s17 = sshll.u32 %s685_s22, 8 }
 0x235   : > { %s756_s28 = scalar_lea.hbm %s807_s5, %s497_s17  ;;  %s414_s26 = sshll.u32 %s230_s12, 4  ;;  %s758_s26 = int_to_ptr.vmem [resolvable:$true] %s414_s26 }
 0x236   : > { %s567_s11 = scalar_lea.vmem %s758_s26, %s747_s15  ;;  %s631_s30 = smov [#allocation2]  }
 0x237   : > { %p568_p13 = scmp.ne.s32.totalorder %s758_s26, %s567_s11  ;;  %s571_s6 = sshll.u32 %s631_s30, 4  ;;  %s572_s6 = int_to_ptr.vmem [resolvable:$false] %s571_s6 }
 0x238   : > { %s573_s22 = scalar_lea.vmem %s572_s6, 512  ;;  %p574_p2 = scmp.lt.s32.totalorder %s758_s26, %s572_s6 }
 0x239   : > { %p569_p0 = pnand %p568_p13, %p491_p12  ;;  %p575_p3 = scmp.lt.s32.totalorder %s573_s22, %s567_s11 }
 0x23b   : > { %p570_p1 = pneg %p569_p0  ;;  %p576_p4 = por %p575_p3, %p574_p2 }
 0x23d   : > { %p577_p5 = pnand %p576_p4, %p570_p1 }
 0x23f   : > { %580 = shalt.err (!%p577_p5)
}
 0x240   : > { %s581_s7 = scalar_lea.hbm %s756_s28, %s747_s15  ;;  %s585_s10 = scalar_lea.hbm %s807_s5, 640 }
 0x241   : > { %p582_p7 = scmp.ne.s32.totalorder %s756_s28, %s581_s7  ;;  %p586_p10 = scmp.lt.u32.totalorder %s756_s28, %s807_s5 }
 0x242   : > { %p587_p11 = scmp.lt.u32.totalorder %s585_s10, %s581_s7  ;;  %p589_p0 = scmp.lt.u32.totalorder %s581_s7, %s756_s28 }
 0x243   : > { %p583_p8 = pnand %p582_p7, %p491_p12 }
 0x244   : > { %p588_p13 = por %p587_p11, %p586_p10 }
 0x245   : > { %p584_p9 = pneg %p583_p8 }
 0x246   : > { %p590_p1 = por %p589_p0, %p588_p13 }
 0x248   : > { %p591_p2 = pnand %p590_p1, %p584_p9 }
 0x24a   : > { %594 = shalt.err (!%p591_p2)
}
 0x24b   : > { %s632_s16 = smov 128   ;;  %s633_s17 = smov 8  }
 0x24c   : > { %420 = dma.vmem_to_hbm [thread:$0]  (%p491_p12), %s758_s26, %s747_s15, %s756_s28, %s742_s13, %s632_s16, %s632_s16, %s633_s17  }
 0x24d PF: > { %p528_p3 = scmp.ge.s32.totalorder %s629_s21, 2  ;;  %s429_s23 = sand.u32 1, %s617_s18  }
 0x24e   : > { %s430_s25 = scalar_lea.sflag [#allocation3], %s429_s23 }
 0x24f   : > { %p525_p4 = pnand %p528_p3, %p706_p6 }
 0x251   : > { %612 = dma.done.wait (!%p525_p4), %s430_s25, 256  }
 0x252   : > { %614 = vsyncadd (!%p525_p4), %s430_s25, 4294967040  ;;  %p15_p5 = scmp.ge.s32.totalorder %s689_s24, 5   ;;  %s810_s18 = smov %s621_s19 }
 0x253   : > { %s811_s19 = smov %s625_s20  ;;  %s812_s20 = smov %s700_s27 }
 0x254   : > { %s813_s21 = smov %s689_s24  ;;  %17 = sbr.rel (!%p15_p5) target bundleno = 3 (0x3), region = 75 }
 0x25b   :  { %435 = vsyncpa [#allocation3], 1 }
 0x25c   :  { %437 = vsyncpa [#allocation3 + $0x1], 1 }

// kernel: tpu_custom_call.1
= control target key start
LH: loop header
LB: loop body
LE: loop exit
PB: predicated region body
PF: predicated region fallthrough
CT: control target
= control target key end

     0   :  { %10 = vsyncpa [#allocation3], 0  ;;  %s802_s0 = inlined_call_operand.vmem [shape: f32[40,32], index: 0, kind: input, shape index: {}]   ;;  %s803_s1 = inlined_call_operand.vmem [shape: f32[32,128], index: 1, kind: input, shape index: {}]   ;;  %s804_s2 = inlined_call_operand.vmem [shape: f32[1,128], index: 2, kind: input, shape index: {}]   ;;  %s805_s3 = inlined_call_operand.vmem [shape: f32[1,128], index: 3, kind: input, shape index: {}]   ;;  %s806_s4 = inlined_call_operand.vmem [shape: f32[1,128], index: 4, kind: input, shape index: {}]   ;;  %s807_s5 = inlined_call_operand.hbm [shape: f32[40,128], index: 5, kind: output, shape index: {}]  }
   0x1   :  { %12 = vsyncpa [#allocation3 + $0x1], 0  ;;  %s664_s18 = smov 0   ;;  %s666_s19 = smov 0  }
   0x2   :  { %s668_s20 = smov 0   ;;  %s670_s21 = smov 0  }
   0x3 LB: > { %s685_s22 = sadd.s32 4294967295, %s629_s21   ;;  %s476_s23 = sadd.s32 4294967294, %s629_s21   ;;  %s629_s21 = sphi %s670_s21, %s813_s21   ;;  %s625_s20 = sphi %s668_s20, %s812_s20   ;;  %s621_s19 = sphi %s666_s19, %s811_s19   ;;  %s617_s18 = sphi %s664_s18, %s810_s18  }
   0x4   : > { %s689_s24 = sadd.s32 1, %s629_s21   ;;  %s135_s25 = sadd.s32 1, %s625_s20 }
   0x5   : > { %s132_s26 = ssub.s32 %s629_s21, %s689_s24  ;;  %p145_p0 = scmp.ne.s32.totalorder %s625_s20, %s621_s19 }
   0x6   : > { %p133_p1 = scmp.eq.s32.totalorder %s132_s26, 0  ;;  %p146_p2 = scmp.eq.s32.totalorder %s685_s22, 2 }
   0x7   : > { %p151_p3 = scmp.ne.s32.totalorder %s621_s19, %s617_s18  ;;  %p152_p4 = scmp.eq.s32.totalorder %s476_s23, 2 }
   0x8   : > { %s700_s27 = scalar_select %p133_p1, %s625_s20, %s135_s25  }
   0x9   : > { %p702_p5 = por %p146_p2, %p145_p0  ;;  %p706_p6 = por %p152_p4, %p151_p3 }
   0xa   : > { %p479_p7 = scmp.ge.s32.totalorder %s629_s21, 1  ;;  %p199_p8 = scmp.lt.s32.totalorder %s629_s21, 4 }
   0xc   : > { %p200_p9 = pnand %p479_p7, %p199_p8 }
   0xd   : > { %v252_v0 = vld [vmem:[%s803_s1] sm:$0xff] (!%p200_p9)  ;;  %v253_v1 = vld [vmem:[%s803_s1 + $0x8] sm:$0xff] (!%p200_p9)  ;;  %v254_v2 = vld [vmem:[%s803_s1 + $0x10] sm:$0xff] (!%p200_p9)  ;;  %s722_s11 = sshll.u32 (!%p200_p9), %s685_s22, 1  ;;  %vm263_vm0 = vcmask (!%p200_p9), 261120   ;;  %v357_v15 = vlaneseq (!%p200_p9)  ;;  %s228_s30 = sand.u32 (!%p200_p9), 1, %s621_s19  }
   0xe   : > { %203 = sbr.rel (%p200_p9) target bundleno = 589 (0x24d), region = 40  ;;  %v515_v3 = vpack.c.bf16 (!%p200_p9), %v253_v1, %v252_v0  ;;  %v255_v4 = vld [vmem:[%s803_s1 + $0x18] sm:$0xff] (!%p200_p9)  ;;  %p236_p10 = scmp.lt.s32.totalorder (!%p200_p9), %s722_s11, 4  ;;  %v483_v8 = vld [vmem:[%s804_s2] ss:$0 sm:$0xff] (!%p200_p9) }
   0xf   : > { %v519_v5 = vpack.c.bf16 (!%p200_p9), %v255_v4, %v254_v2  ;;  %v358_v16 = vand.u32 (!%p200_p9), 127, %v357_v15  ;;  %v486_v34 = vld [vmem:[%s805_s3] ss:$0 sm:$0xff] (!%p200_p9)  ;;  %s480_s8 = sshll.u32 (!%p200_p9), %s228_s30, 4  ;;  %s742_s13 = scalar_lea.sflag (!%p200_p9), [#allocation3], %s228_s30 }
  0x10   : > { %516 = vmatprep.subr.bf16.mxu0 (!%p200_p9), %v515_v3  ;;  %v487_v36 = vld [vmem:[%s806_s4] ss:$0 sm:$0xff] (!%p200_p9)  ;;  %s230_s12 = scalar_lea.vmem (!%p200_p9), [#allocation2], %s480_s8 }
  0x11   : > { %518 = vmatpush3.bf16.msra.mxu0 (!%p200_p9), %v515_v3  ;;  %vm359_vm1 = vcmp.lt.s32.totalorder (!%p200_p9), %v358_v16, 64 }
  0x12   : > { %520 = vmatprep.subr.bf16.mxu0 (!%p200_p9), %v519_v5 }
  0x15   : > { %s237_s14 = scalar_select %p236_p10, %s722_s11, 4  ;;  %522 = vmatpush3.bf16.msra.mxu0 %v519_v5 }
  0x17   : > { %s482_s15 = sshll.u32 %s237_s14, 3  ;;  %s403_s14 = ssub.s32 (%p702_p5), 5, %s722_s11 }
  0x18   : > { %s239_s23 = scalar_lea.vmem %s802_s0, %s482_s15  ;;  %p404_p11 = scmp.lt.s32.totalorder (%p702_p5), %s403_s14, 2 }
  0x19   : > { %v250_v6 = vld [vmem:[%s239_s23] sm:$0xff]  ;;  %v251_v7 = vld [vmem:[%s239_s23 + $0x8] sm:$0xff] }
  0x1a   : > { %512 = vmatprep.mubr.msk.f32.mxu0 %vm263_vm0, %v250_v6 }
  0x1b   : > { %513 = vmatmul.mubr.msk.f32.vlgmr.msra.gmra.mrb[0].mxu0 %vm263_vm0, %v251_v7 }
  0xee   : > { %v514_v9 = vpop.f32.mrb[0].mxu0 }
  0xef   : > { %v336_v10 = vpop.f32.mrb[1].mxu0  ;;  %v342_v12 = vadd.f32 %v514_v9, %v483_v8 }
  0xf0   : > { %v337_v11 = vadd.f32 %v483_v8, %v336_v10 }
  0xf1   : > { %v346_v14 = vmax.f32 %v342_v12, 0.0 }
  0xf2   : > { %v345_v13 = vmax.f32 %v337_v11, 0.0 }
  0xf4   : > { %349 = vadd.xlane.f32.xlu0 %v345_v13 }
  0xf8   : > { %351 = vadd.xlane.f32.xlu0 %v346_v14 }
 0x181   : > { %v350_v17 = vpop.xlane.xlu0 %349 }
 0x182   : > { %v353_v18 = vmul.f32 0.015625, %v350_v17 }
 0x184   : > { %v355_v19 = vsub.f32 %v345_v13, %v353_v18 }
 0x185   : > { %v352_v20 = vpop.xlane.xlu0 %351 }
 0x186   : > { %v354_v21 = vmul.f32 0.015625, %v352_v20  ;;  %v360_v22 = vsel %vm359_vm1, %v355_v19, 0.0 }
 0x187   : > { %v362_v23 = vmul.f32 %v360_v22, %v360_v22 }
 0x188   : > { %v356_v24 = vsub.f32 %v346_v14, %v354_v21 }
 0x189   : > { %364 = vadd.xlane.f32.xlu1 %v362_v23 }
 0x18a   : > { %v361_v25 = vsel %vm359_vm1, %v356_v24, 0.0 }
 0x18b   : > { %v363_v26 = vmul.f32 %v361_v25, %v361_v25 }
 0x18d   : > { %366 = vadd.xlane.f32.xlu1 %v363_v26 }
 0x216   : > { %v365_v27 = vpop.xlane.xlu1 %364 }
 0x217   : > { %v368_v28 = vmul.f32 0.015625, %v365_v27 }
 0x219   : > { %v370_v29 = vadd.f32 1e-05, %v368_v28 }
 0x21a   : > { %v367_v30 = vpop.xlane.xlu1 %366 }
 0x21b   : > { %563 = vrsqrt.f32 %v370_v29  ;;  %v369_v31 = vmul.f32 0.015625, %v367_v30 }
 0x21d   : > { %v371_v32 = vadd.f32 1e-05, %v369_v31 }
 0x21f   : > { %565 = vrsqrt.f32 %v371_v32 }
 0x225   : > { %v564_v33 = vpop.eup %563 }
 0x226   : > { %v374_v35 = vmul.f32 %v564_v33, %v355_v19 }
 0x228   : > { %v382_v37 = vmul.f32 %v486_v34, %v374_v35 }
 0x229   : > { %v566_v38 = vpop.eup %565 }
 0x22a   : > { %v390_v39 = vadd.f32 %v487_v36, %v382_v37  ;;  %v375_v40 = vmul.f32 %v566_v38, %v356_v24  ;;  %401 = sbr.rel (!%p702_p5) target bundleno = 589 (0x24d), region = 44 }
 0x22c   : > { %392 = vst [vmem:[%s230_s12] sm:$0xff] %v390_v39  ;;  %v383_v41 = vmul.f32 %v486_v34, %v375_v40 }
 0x22e   : > { %v391_v42 = vadd.f32 %v487_v36, %v383_v41 }
 0x230   : > { %393 = vst [vmem:[%s230_s12 + $0x8] sm:$0xff] %v391_v42 }
 0x231   : > { %s815_s14 = smov (!%p404_p11, %s403_s14), 2 }
 0x232   : > { %s747_s15 = sshll.u32 %s815_s14, 7 }
 0x233   : > { %s408_s16 = ssub.s32 256, %s747_s15 }
 0x234   : > { %409 = vsyncadd %s742_s13, %s408_s16  ;;  %p491_p12 = scmp.ne.s32.totalorder %s747_s15, 0  ;;  %s497_s17 = sshll.u32 %s685_s22, 8 }
 0x235   : > { %s756_s28 = scalar_lea.hbm %s807_s5, %s497_s17  ;;  %s414_s26 = sshll.u32 %s230_s12, 4  ;;  %s758_s26 = int_to_ptr.vmem [resolvable:$true] %s414_s26 }
 0x236   : > { %s567_s11 = scalar_lea.vmem %s758_s26, %s747_s15  ;;  %s631_s30 = smov [#allocation2]  }
 0x237   : > { %p568_p13 = scmp.ne.s32.totalorder %s758_s26, %s567_s11  ;;  %s571_s6 = sshll.u32 %s631_s30, 4  ;;  %s572_s6 = int_to_ptr.vmem [resolvable:$false] %s571_s6 }
 0x238   : > { %s573_s22 = scalar_lea.vmem %s572_s6, 512  ;;  %p574_p2 = scmp.lt.s32.totalorder %s758_s26, %s572_s6 }
 0x239   : > { %p569_p0 = pnand %p568_p13, %p491_p12  ;;  %p575_p3 = scmp.lt.s32.totalorder %s573_s22, %s567_s11 }
 0x23b   : > { %p570_p1 = pneg %p569_p0  ;;  %p576_p4 = por %p575_p3, %p574_p2 }
 0x23d   : > { %p577_p5 = pnand %p576_p4, %p570_p1 }
 0x23f   : > { %580 = shalt.err (!%p577_p5)
}
 0x240   : > { %s581_s7 = scalar_lea.hbm %s756_s28, %s747_s15  ;;  %s585_s10 = scalar_lea.hbm %s807_s5, 640 }
 0x241   : > { %p582_p7 = scmp.ne.s32.totalorder %s756_s28, %s581_s7  ;;  %p586_p10 = scmp.lt.u32.totalorder %s756_s28, %s807_s5 }
 0x242   : > { %p587_p11 = scmp.lt.u32.totalorder %s585_s10, %s581_s7  ;;  %p589_p0 = scmp.lt.u32.totalorder %s581_s7, %s756_s28 }
 0x243   : > { %p583_p8 = pnand %p582_p7, %p491_p12 }
 0x244   : > { %p588_p13 = por %p587_p11, %p586_p10 }
 0x245   : > { %p584_p9 = pneg %p583_p8 }
 0x246   : > { %p590_p1 = por %p589_p0, %p588_p13 }
 0x248   : > { %p591_p2 = pnand %p590_p1, %p584_p9 }
 0x24a   : > { %594 = shalt.err (!%p591_p2)
}
 0x24b   : > { %s632_s16 = smov 128   ;;  %s633_s17 = smov 8  }
 0x24c   : > { %420 = dma.vmem_to_hbm [thread:$0]  (%p491_p12), %s758_s26, %s747_s15, %s756_s28, %s742_s13, %s632_s16, %s632_s16, %s633_s17  }
 0x24d PF: > { %p528_p3 = scmp.ge.s32.totalorder %s629_s21, 2  ;;  %s429_s23 = sand.u32 1, %s617_s18  }
 0x24e   : > { %s430_s25 = scalar_lea.sflag [#allocation3], %s429_s23 }
 0x24f   : > { %p525_p4 = pnand %p528_p3, %p706_p6 }
 0x251   : > { %612 = dma.done.wait (!%p525_p4), %s430_s25, 256  }
 0x252   : > { %614 = vsyncadd (!%p525_p4), %s430_s25, 4294967040  ;;  %p15_p5 = scmp.ge.s32.totalorder %s689_s24, 5   ;;  %s810_s18 = smov %s621_s19 }
 0x253   : > { %s811_s19 = smov %s625_s20  ;;  %s812_s20 = smov %s700_s27 }
 0x254   : > { %s813_s21 = smov %s689_s24  ;;  %17 = sbr.rel (!%p15_p5) target bundleno = 3 (0x3), region = 75 }
 0x25b   :  { %435 = vsyncpa [#allocation3], 1 }
 0x25c   :  { %437 = vsyncpa [#allocation3 + $0x1], 1 }

</bundles_post_ra>
